<compile_context>
chip_gen: v6e
topology: v6e:2x2x1
jax: 0.10.0
libtpu: 0.0.40
codegen_flags: <defaults>
</compile_context>

<pallas_src>
import jax
import jax.numpy as jnp
from jax import lax
from jax.experimental import pallas as pl
from jax.experimental.pallas import tpu as pltpu


def _round_up(x, m):
    return ((x + m - 1) // m) * m


def _layernorm_padded(x, g, b, n_real, eps=1e-5):
    # x has zero pad lanes beyond n_real; sums over 128 lanes are therefore
    # correct, but statistics are divided by the REAL feature count.
    lane = lax.broadcasted_iota(jnp.int32, x.shape, 1)
    valid = lane < n_real
    mu = jnp.sum(x, axis=-1, keepdims=True) / n_real
    d = jnp.where(valid, x - mu, 0.0)
    var = jnp.sum(d * d, axis=-1, keepdims=True) / n_real
    return d * lax.rsqrt(var + eps) * g + b   # pad lanes stay exactly 0


def _bf16_dot(a_f32, w_bf16):
    # bf16 MXU operands, f32 accumulation.
    return jnp.dot(a_f32.astype(jnp.bfloat16), w_bf16,
                   preferred_element_type=jnp.float32)


def gr_actor_forward(obs, node_obs, adj, agent_id, params, *, tile_b=None):
    B, obs_dim = obs.shape
    _, N, F = node_obs.shape
    H = params['w_embed'].shape[1]     # true hidden size (e.g. 64)
    A = params['w_act'].shape[1]       # true action dim

    H_PAD = 128                        # hidden padded to full lane width
    A_PAD = 128                        # action logits padded to full lane width
    F_IN = F + 1                       # node features + ego adjacency weight
    F_PAD = _round_up(F_IN, 16)        # bf16 sublane multiple (K of embed matmul)
    OBS_PAD = _round_up(obs_dim, 16)
    LANES = 128

    # Tile selection: single step for small B (per-step overhead dominates),
    # big 8/128-aligned tiles otherwise (better MXU fill + v7x megacore).
    if tile_b is None:
        tile_b = B if B <= 256 else 256
    assert B % tile_b == 0, "B must be a multiple of tile_b"
    assert tile_b % 8 == 0 or tile_b == B, "tile_b must be a multiple of 8 or == B"
    n_tiles = B // tile_b

    # ---------------- host-side input packing ----------------
    # Ego adjacency row gather (agent_id used ONLY here). Reference:
    # (adj @ h)[b, agent_id[b]] == sum_n adj[b, agent_id[b], n] * h[b, n].
    # NOTE: out-of-range agent_id is silently clamped by the gather.
    adj_ego = jnp.take_along_axis(
        adj, agent_id[:, :, None].astype(jnp.int32), axis=1)[:, 0, :]   # (B, N)

    node_in = jnp.zeros((B, N, F_PAD), jnp.float32)
    node_in = node_in.at[:, :, :F].set(node_obs.astype(jnp.float32))
    node_in = node_in.at[:, :, F].set(adj_ego.astype(jnp.float32))

    obs_p = jnp.zeros((B, OBS_PAD), jnp.float32).at[:, :obs_dim].set(
        obs.astype(jnp.float32))

    # ---------------- host-side parameter packing ----------------
    def pad2(w, rows, cols):
        out = jnp.zeros((rows, cols), jnp.float32)
        return out.at[:w.shape[0], :w.shape[1]].set(w.astype(jnp.float32))

    def pad_row(v, cols):
        out = jnp.zeros((1, cols), jnp.float32)
        v = jnp.asarray(v, jnp.float32).reshape(1, -1)
        return out.at[:, :v.shape[1]].set(v)

    # bf16 weight slab, row-stacked; each sub-block 16-row aligned.
    we = pad2(params['w_embed'], F_PAD, H_PAD)     # adjacency lane row stays 0
    wm = pad2(params['w_msg'], H_PAD, H_PAD)
    w1o = pad2(params['w1_obs'], OBS_PAD, H_PAD)
    w1n = pad2(params['w1_nbd'], H_PAD, H_PAD)
    w2 = pad2(params['w2'], H_PAD, H_PAD)
    w_slab = jnp.concatenate([we, wm, w1o, w1n, w2], axis=0).astype(jnp.bfloat16)

    WE_OFF = 0
    WM_OFF = WE_OFF + F_PAD
    W1O_OFF = WM_OFF + H_PAD
    W1N_OFF = W1O_OFF + OBS_PAD
    W2_OFF = W1N_OFF + H_PAD

    # f32 slab: 8 bias/LN rows, then the f32 action head (8-row aligned), bias.
    p_slab = jnp.concatenate(
        [pad_row(params['b_embed'], H_PAD),    # row 0
         pad_row(params['b_msg'], H_PAD),      # row 1
         pad_row(params['b1'], H_PAD),         # row 2
         pad_row(params['ln1_g'], H_PAD),      # row 3
         pad_row(params['ln1_b'], H_PAD),      # row 4
         pad_row(params['b2'], H_PAD),         # row 5
         pad_row(params['ln2_g'], H_PAD),      # row 6
         pad_row(params['ln2_b'], H_PAD),      # row 7
         pad2(params['w_act'], H_PAD, A_PAD),  # rows 8 .. 8+H_PAD
         pad_row(params['b_act'], A_PAD)],     # row 8+H_PAD
        axis=0)
    WA_OFF = 8
    BA_OFF = 8 + H_PAD

    # ---------------- kernel ----------------
    def kernel(node_ref, obs_ref, w_ref, p_ref, out_ref):
        Bt = node_ref.shape[0]

        # Resident parameter views (static slices).
        w_embed = w_ref[WE_OFF:WE_OFF + F_PAD, :]
        w_msg = w_ref[WM_OFF:WM_OFF + H_PAD, :]
        w1_obs = w_ref[W1O_OFF:W1O_OFF + OBS_PAD, :]
        w1_nbd = w_ref[W1N_OFF:W1N_OFF + H_PAD, :]
        w2_w = w_ref[W2_OFF:W2_OFF + H_PAD, :]

        b_embed = p_ref[0:1, :]
        b_msg = p_ref[1:2, :]
        b1 = p_ref[2:3, :]
        g1 = p_ref[3:4, :]
        bt1 = p_ref[4:5, :]
        b2 = p_ref[5:6, :]
        g2 = p_ref[6:7, :]
        bt2 = p_ref[7:8, :]
        w_act = p_ref[WA_OFF:WA_OFF + H_PAD, :]        # f32 action head
        b_act = p_ref[BA_OFF:BA_OFF + 1, :]

        node_in_v = node_ref[...]                       # (Bt, N, F_PAD) f32
        obs_v = obs_ref[...]                            # (Bt, OBS_PAD)  f32

        # ---------------- GNNBase (ego-node aggregation) ----------------
        # Node embedding as one flat 2-D matmul; adjacency lane hits a zero
        # weight row so it does not contribute.
        nf = node_in_v.reshape(Bt * N, F_PAD)
        h = _bf16_dot(nf, w_embed) + b_embed
        h = jnp.maximum(h, 0.0).reshape(Bt, N, H_PAD)   # (Bt, N, H_PAD)

        # Ego-row weighted aggregation: cheap XLU sublane reduce (kept off MXU).
        adj_w = node_in_v[:, :, F:F + 1]                # (Bt, N, 1) ego weights
        m_ego = jnp.sum(adj_w * h, axis=1)              # (Bt, H_PAD)

        nbd = _bf16_dot(m_ego, w_msg) + b_msg
        nbd = jnp.maximum(nbd, 0.0)                     # (Bt, H_PAD)

        # ---------------- MLPBase ----------------
        # concat(obs, nbd) @ W1 == obs @ w1_obs + nbd @ w1_nbd (W1 pre-split,
        # concat order (obs, gnn_feat) matches the torch.cat in the reference).
        x = _bf16_dot(obs_v, w1_obs) + _bf16_dot(nbd, w1_nbd) + b1
        x = jnp.maximum(x, 0.0)
        x = _layernorm_padded(x, g1, bt1, H)

        x = _bf16_dot(x, w2_w) + b2
        x = jnp.maximum(x, 0.0)
        x = _layernorm_padded(x, g2, bt2, H)            # (Bt, H_PAD)

        # ---------------- ACTLayer ----------------
        # Final matmul kept in f32 (tiny) to avoid bf16 argmax flips.
        logits = jnp.dot(x, w_act, preferred_element_type=jnp.float32) + b_act
        lane = lax.broadcasted_iota(jnp.int32, logits.shape, 1)
        logits = jnp.where(lane < A, logits, jnp.float32(-1e30))   # mask pad lanes

        mx = jnp.max(logits, axis=-1, keepdims=True)
        lse = jnp.log(jnp.sum(jnp.exp(logits - mx), axis=-1, keepdims=True))

        # Deterministic action = argmax (first occurrence on ties).
        action = jnp.min(jnp.where(logits == mx, lane, jnp.int32(A_PAD)),
                         axis=-1, keepdims=True)                    # (Bt, 1)
        chosen = jnp.sum(jnp.where(lane == action, logits - mx - lse, 0.0),
                         axis=-1, keepdims=True)                    # (Bt, 1)

        # Single merged lane-dense output slab (unmasked vst):
        #   lane 0 = action (as f32, exact), lane 1.. = chosen log-prob.
        out_lane = lax.broadcasted_iota(jnp.int32, out_ref.shape, 1)
        out_ref[...] = jnp.where(out_lane == 0, action.astype(jnp.float32), chosen)

    # ---------------- pallas_call ----------------
    in_specs = [
        pl.BlockSpec((tile_b, N, F_PAD), lambda i: (i, 0, 0)),   # node + adj_ego slab
        pl.BlockSpec((tile_b, OBS_PAD), lambda i: (i, 0)),       # obs slab
        pl.BlockSpec(w_slab.shape, lambda i: (0, 0)),            # resident bf16 weights
        pl.BlockSpec(p_slab.shape, lambda i: (0, 0)),            # resident f32 bias/LN/head
    ]
    out_specs = pl.BlockSpec((tile_b, LANES), lambda i: (i, 0))
    out_shape = jax.ShapeDtypeStruct((B, LANES), jnp.float32)

    flops = 2 * B * (N * F_PAD * H_PAD + 3 * H_PAD * H_PAD
                     + OBS_PAD * H_PAD + H_PAD * A_PAD)
    bytes_accessed = int(node_in.size * 4 + obs_p.size * 4 + B * LANES * 4
                         + w_slab.size * 2 + p_slab.size * 4)
    cost = pl.CostEstimate(flops=flops, transcendentals=B * (A_PAD + 4),
                           bytes_accessed=bytes_accessed)

    out_slab = pl.pallas_call(
        kernel,
        grid=(n_tiles,),
        out_shape=out_shape,
        in_specs=in_specs,
        out_specs=out_specs,
        compiler_params=pltpu.CompilerParams(
            dimension_semantics=("parallel",)),   # megacore batch sharding (v7x)
        cost_estimate=cost,
    )(node_in, obs_p, w_slab, p_slab)

    actions = out_slab[:, 0:1].astype(jnp.int32)
    action_log_probs = out_slab[:, 1:2]
    return actions, action_log_probs


def init_params(key, obs_dim, node_feat, hidden, action_dim):
    ks = jax.random.split(key, 6)
    scale = 0.1
    return {
        'w_embed': scale * jax.random.normal(ks[0], (node_feat, hidden), jnp.float32),
        'b_embed': jnp.zeros((1, hidden), jnp.float32),
        'w_msg':   scale * jax.random.normal(ks[1], (hidden, hidden), jnp.float32),
        'b_msg':   jnp.zeros((1, hidden), jnp.float32),
        # W1 pre-split on the host: concat(obs, gnn_feat) @ W1
        #   == obs @ w1_obs + gnn_feat @ w1_nbd
        'w1_obs':  scale * jax.random.normal(ks[2], (obs_dim, hidden), jnp.float32),
        'w1_nbd':  scale * jax.random.normal(ks[3], (hidden, hidden), jnp.float32),
        'b1':      jnp.zeros((1, hidden), jnp.float32),
        'ln1_g':   jnp.ones((1, hidden), jnp.float32),
        'ln1_b':   jnp.zeros((1, hidden), jnp.float32),
        'w2':      scale * jax.random.normal(ks[4], (hidden, hidden), jnp.float32),
        'b2':      jnp.zeros((1, hidden), jnp.float32),
        'ln2_g':   jnp.ones((1, hidden), jnp.float32),
        'ln2_b':   jnp.zeros((1, hidden), jnp.float32),
        'w_act':   scale * jax.random.normal(ks[5], (hidden, action_dim), jnp.float32),
        'b_act':   jnp.zeros((1, action_dim), jnp.float32),
    }


if __name__ == "__main__":
    B, N_NODES, NODE_FEAT, OBS_DIM, HIDDEN, ACT_DIM = 16, 8, 6, 10, 64, 5

    key = jax.random.PRNGKey(0)
    k_obs, k_node, k_adj, k_id, k_par = jax.random.split(key, 5)

    obs = jax.random.normal(k_obs, (B, OBS_DIM), jnp.float32)
    node_obs = jax.random.normal(k_node, (B, N_NODES, NODE_FEAT), jnp.float32)
    adj = jax.random.uniform(k_adj, (B, N_NODES, N_NODES), jnp.float32)
    agent_id = jax.random.randint(k_id, (B, 1), 0, N_NODES, jnp.int32)

    params = init_params(k_par, OBS_DIM, NODE_FEAT, HIDDEN, ACT_DIM)

    # tile_b=None -> tile_b == B (single grid step; no per-step overhead at B=16).
    actions, action_log_probs = gr_actor_forward(
        obs, node_obs, adj, agent_id, params)
    jax.block_until_ready((actions, action_log_probs))

    assert actions.shape == (B, 1) and actions.dtype == jnp.int32
    assert action_log_probs.shape == (B, 1) and action_log_probs.dtype == jnp.float32
    assert bool(jnp.all((actions >= 0) & (actions < ACT_DIM)))
    assert bool(jnp.all(action_log_probs <= 0.0))
    print("KERNEL_OK")
</pallas_src>

<mosaic_0001>
module attributes {stable_mosaic.version = 11 : i64} {
  func.func @kernel(%arg0: i32, %arg1: memref<16x8x16xf32, #tpu.memory_space<vmem>>, %arg2: memref<16x16xf32, #tpu.memory_space<vmem>>, %arg3: memref<416x128xbf16, #tpu.memory_space<vmem>>, %arg4: memref<137x128xf32, #tpu.memory_space<vmem>>, %arg5: memref<16x128xf32, #tpu.memory_space<vmem>>) attributes {dimension_semantics = [#tpu.dimension_semantics<parallel>], iteration_bounds = array<i64: 1>, scalar_prefetch = 0 : i64, scratch_operands = 0 : i64, tpu.core_type = #tpu.core_type<tc>, window_params = [{transform_indices = @transform_0, window_bounds = array<i64: 16, 8, 16>}, {transform_indices = @transform_1, window_bounds = array<i64: 16, 16>}, {pipeline_mode = #tpu.pipeline_mode<synchronous>, transform_indices = @transform_2, window_bounds = array<i64: 416, 128>}, {pipeline_mode = #tpu.pipeline_mode<synchronous>, transform_indices = @transform_3, window_bounds = array<i64: 137, 128>}, {transform_indices = @transform_4, window_bounds = array<i64: 16, 128>}]} {
    %c0 = arith.constant 0 : index
    %c0_0 = arith.constant 0 : index
    %0 = vector.load %arg3[%c0, %c0_0] : memref<416x128xbf16, #tpu.memory_space<vmem>>, vector<16x128xbf16>
    %c16 = arith.constant 16 : index
    %c0_1 = arith.constant 0 : index
    %1 = vector.load %arg3[%c16, %c0_1] : memref<416x128xbf16, #tpu.memory_space<vmem>>, vector<128x128xbf16>
    %c144 = arith.constant 144 : index
    %c0_2 = arith.constant 0 : index
    %2 = vector.load %arg3[%c144, %c0_2] : memref<416x128xbf16, #tpu.memory_space<vmem>>, vector<16x128xbf16>
    %c160 = arith.constant 160 : index
    %c0_3 = arith.constant 0 : index
    %3 = vector.load %arg3[%c160, %c0_3] : memref<416x128xbf16, #tpu.memory_space<vmem>>, vector<128x128xbf16>
    %c288 = arith.constant 288 : index
    %c0_4 = arith.constant 0 : index
    %4 = vector.load %arg3[%c288, %c0_4] : memref<416x128xbf16, #tpu.memory_space<vmem>>, vector<128x128xbf16>
    %c0_5 = arith.constant 0 : index
    %c0_6 = arith.constant 0 : index
    %5 = vector.load %arg4[%c0_5, %c0_6] : memref<137x128xf32, #tpu.memory_space<vmem>>, vector<1x128xf32>
    %c1 = arith.constant 1 : index
    %c0_7 = arith.constant 0 : index
    %6 = vector.load %arg4[%c1, %c0_7] : memref<137x128xf32, #tpu.memory_space<vmem>>, vector<1x128xf32>
    %c2 = arith.constant 2 : index
    %c0_8 = arith.constant 0 : index
    %7 = vector.load %arg4[%c2, %c0_8] : memref<137x128xf32, #tpu.memory_space<vmem>>, vector<1x128xf32>
    %c3 = arith.constant 3 : index
    %c0_9 = arith.constant 0 : index
    %8 = vector.load %arg4[%c3, %c0_9] : memref<137x128xf32, #tpu.memory_space<vmem>>, vector<1x128xf32>
    %c4 = arith.constant 4 : index
    %c0_10 = arith.constant 0 : index
    %9 = vector.load %arg4[%c4, %c0_10] : memref<137x128xf32, #tpu.memory_space<vmem>>, vector<1x128xf32>
    %c5 = arith.constant 5 : index
    %c0_11 = arith.constant 0 : index
    %10 = vector.load %arg4[%c5, %c0_11] : memref<137x128xf32, #tpu.memory_space<vmem>>, vector<1x128xf32>
    %c6 = arith.constant 6 : index
    %c0_12 = arith.constant 0 : index
    %11 = vector.load %arg4[%c6, %c0_12] : memref<137x128xf32, #tpu.memory_space<vmem>>, vector<1x128xf32>
    %c7 = arith.constant 7 : index
    %c0_13 = arith.constant 0 : index
    %12 = vector.load %arg4[%c7, %c0_13] : memref<137x128xf32, #tpu.memory_space<vmem>>, vector<1x128xf32>
    %c8 = arith.constant 8 : index
    %c0_14 = arith.constant 0 : index
    %13 = vector.load %arg4[%c8, %c0_14] : memref<137x128xf32, #tpu.memory_space<vmem>>, vector<128x128xf32>
    %c136 = arith.constant 136 : index
    %c0_15 = arith.constant 0 : index
    %14 = vector.load %arg4[%c136, %c0_15] : memref<137x128xf32, #tpu.memory_space<vmem>>, vector<1x128xf32>
    %c0_16 = arith.constant 0 : index
    %c0_17 = arith.constant 0 : index
    %c0_18 = arith.constant 0 : index
    %15 = vector.load %arg1[%c0_16, %c0_17, %c0_18] : memref<16x8x16xf32, #tpu.memory_space<vmem>>, vector<16x8x16xf32>
    %c0_19 = arith.constant 0 : index
    %c0_20 = arith.constant 0 : index
    %16 = vector.load %arg2[%c0_19, %c0_20] : memref<16x16xf32, #tpu.memory_space<vmem>>, vector<16x16xf32>
    %17 = vector.shape_cast %15 : vector<16x8x16xf32> to vector<128x16xf32>
    %18 = arith.truncf %17 : vector<128x16xf32> to vector<128x16xbf16>
    %cst = arith.constant dense<0.000000e+00> : vector<128x128xf32>
    %19 = tpu.matmul %18, %0, %cst {dimension_numbers = #tpu.dot_dimension_numbers<[1], [0], [0], [1], [0, 0, 1, 1], [], []>} : vector<128x16xbf16>, vector<16x128xbf16>, vector<128x128xf32> -> vector<128x128xf32>
    %20 = vector.broadcast %5 : vector<1x128xf32> to vector<128x128xf32>
    %21 = arith.addf %19, %20 : vector<128x128xf32>
    %cst_21 = arith.constant 0.000000e+00 : f32
    %22 = vector.broadcast %cst_21 : f32 to vector<128x128xf32>
    %23 = arith.maximumf %21, %22 : vector<128x128xf32>
    %24 = vector.shape_cast %23 : vector<128x128xf32> to vector<16x8x128xf32>
    %25 = vector.extract_strided_slice %15 {offsets = [0, 0, 6], sizes = [16, 8, 1], strides = [1, 1, 1]} : vector<16x8x16xf32> to vector<16x8x1xf32>
    %26 = vector.broadcast %25 : vector<16x8x1xf32> to vector<16x8x128xf32>
    %27 = arith.mulf %26, %24 : vector<16x8x128xf32>
    %cst_22 = arith.constant dense<0.000000e+00> : vector<16x128xf32>
    %28 = vector.multi_reduction <add>, %27, %cst_22 [1] : vector<16x8x128xf32> to vector<16x128xf32>
    %29 = arith.truncf %28 : vector<16x128xf32> to vector<16x128xbf16>
    %cst_23 = arith.constant dense<0.000000e+00> : vector<16x128xf32>
    %30 = tpu.matmul %29, %1, %cst_23 {dimension_numbers = #tpu.dot_dimension_numbers<[1], [0], [0], [1], [0, 0, 1, 1], [], []>} : vector<16x128xbf16>, vector<128x128xbf16>, vector<16x128xf32> -> vector<16x128xf32>
    %31 = vector.broadcast %6 : vector<1x128xf32> to vector<16x128xf32>
    %32 = arith.addf %30, %31 : vector<16x128xf32>
    %cst_24 = arith.constant 0.000000e+00 : f32
    %33 = vector.broadcast %cst_24 : f32 to vector<16x128xf32>
    %34 = arith.maximumf %32, %33 : vector<16x128xf32>
    %35 = arith.truncf %16 : vector<16x16xf32> to vector<16x16xbf16>
    %cst_25 = arith.constant dense<0.000000e+00> : vector<16x128xf32>
    %36 = tpu.matmul %35, %2, %cst_25 {dimension_numbers = #tpu.dot_dimension_numbers<[1], [0], [0], [1], [0, 0, 1, 1], [], []>} : vector<16x16xbf16>, vector<16x128xbf16>, vector<16x128xf32> -> vector<16x128xf32>
    %37 = arith.truncf %34 : vector<16x128xf32> to vector<16x128xbf16>
    %cst_26 = arith.constant dense<0.000000e+00> : vector<16x128xf32>
    %38 = tpu.matmul %37, %3, %cst_26 {dimension_numbers = #tpu.dot_dimension_numbers<[1], [0], [0], [1], [0, 0, 1, 1], [], []>} : vector<16x128xbf16>, vector<128x128xbf16>, vector<16x128xf32> -> vector<16x128xf32>
    %39 = arith.addf %36, %38 : vector<16x128xf32>
    %40 = vector.broadcast %7 : vector<1x128xf32> to vector<16x128xf32>
    %41 = arith.addf %39, %40 : vector<16x128xf32>
    %cst_27 = arith.constant 0.000000e+00 : f32
    %42 = vector.broadcast %cst_27 : f32 to vector<16x128xf32>
    %43 = arith.maximumf %41, %42 : vector<16x128xf32>
    %44 = tpu.iota {dimensions = array<i32: 1>} : vector<16x128xi32>
    %c64_i32 = arith.constant 64 : i32
    %45 = vector.broadcast %c64_i32 : i32 to vector<16x128xi32>
    %46 = arith.cmpi slt, %44, %45 : vector<16x128xi32>
    %cst_28 = arith.constant dense<0.000000e+00> : vector<16xf32>
    %47 = vector.multi_reduction <add>, %43, %cst_28 [1] : vector<16x128xf32> to vector<16xf32>
    %48 = vector.shape_cast %47 : vector<16xf32> to vector<16x1xf32>
    %cst_29 = arith.constant 6.400000e+01 : f32
    %49 = vector.broadcast %cst_29 : f32 to vector<16x1xf32>
    %50 = arith.divf %48, %49 : vector<16x1xf32>
    %51 = vector.broadcast %50 : vector<16x1xf32> to vector<16x128xf32>
    %52 = arith.subf %43, %51 : vector<16x128xf32>
    %cst_30 = arith.constant 0.000000e+00 : f32
    %53 = vector.broadcast %cst_30 : f32 to vector<16x128xf32>
    %54 = arith.select %46, %52, %53 : vector<16x128xi1>, vector<16x128xf32>
    %55 = arith.mulf %54, %54 : vector<16x128xf32>
    %cst_31 = arith.constant dense<0.000000e+00> : vector<16xf32>
    %56 = vector.multi_reduction <add>, %55, %cst_31 [1] : vector<16x128xf32> to vector<16xf32>
    %57 = vector.shape_cast %56 : vector<16xf32> to vector<16x1xf32>
    %cst_32 = arith.constant 6.400000e+01 : f32
    %58 = vector.broadcast %cst_32 : f32 to vector<16x1xf32>
    %59 = arith.divf %57, %58 : vector<16x1xf32>
    %cst_33 = arith.constant 9.99999974E-6 : f32
    %60 = vector.broadcast %cst_33 : f32 to vector<16x1xf32>
    %61 = arith.addf %59, %60 : vector<16x1xf32>
    %62 = math.rsqrt %61 : vector<16x1xf32>
    %63 = vector.broadcast %62 : vector<16x1xf32> to vector<16x128xf32>
    %64 = arith.mulf %54, %63 : vector<16x128xf32>
    %65 = vector.broadcast %8 : vector<1x128xf32> to vector<16x128xf32>
    %66 = arith.mulf %64, %65 : vector<16x128xf32>
    %67 = vector.broadcast %9 : vector<1x128xf32> to vector<16x128xf32>
    %68 = arith.addf %66, %67 : vector<16x128xf32>
    %69 = arith.truncf %68 : vector<16x128xf32> to vector<16x128xbf16>
    %cst_34 = arith.constant dense<0.000000e+00> : vector<16x128xf32>
    %70 = tpu.matmul %69, %4, %cst_34 {dimension_numbers = #tpu.dot_dimension_numbers<[1], [0], [0], [1], [0, 0, 1, 1], [], []>} : vector<16x128xbf16>, vector<128x128xbf16>, vector<16x128xf32> -> vector<16x128xf32>
    %71 = vector.broadcast %10 : vector<1x128xf32> to vector<16x128xf32>
    %72 = arith.addf %70, %71 : vector<16x128xf32>
    %cst_35 = arith.constant 0.000000e+00 : f32
    %73 = vector.broadcast %cst_35 : f32 to vector<16x128xf32>
    %74 = arith.maximumf %72, %73 : vector<16x128xf32>
    %75 = tpu.iota {dimensions = array<i32: 1>} : vector<16x128xi32>
    %c64_i32_36 = arith.constant 64 : i32
    %76 = vector.broadcast %c64_i32_36 : i32 to vector<16x128xi32>
    %77 = arith.cmpi slt, %75, %76 : vector<16x128xi32>
    %cst_37 = arith.constant dense<0.000000e+00> : vector<16xf32>
    %78 = vector.multi_reduction <add>, %74, %cst_37 [1] : vector<16x128xf32> to vector<16xf32>
    %79 = vector.shape_cast %78 : vector<16xf32> to vector<16x1xf32>
    %cst_38 = arith.constant 6.400000e+01 : f32
    %80 = vector.broadcast %cst_38 : f32 to vector<16x1xf32>
    %81 = arith.divf %79, %80 : vector<16x1xf32>
    %82 = vector.broadcast %81 : vector<16x1xf32> to vector<16x128xf32>
    %83 = arith.subf %74, %82 : vector<16x128xf32>
    %cst_39 = arith.constant 0.000000e+00 : f32
    %84 = vector.broadcast %cst_39 : f32 to vector<16x128xf32>
    %85 = arith.select %77, %83, %84 : vector<16x128xi1>, vector<16x128xf32>
    %86 = arith.mulf %85, %85 : vector<16x128xf32>
    %cst_40 = arith.constant dense<0.000000e+00> : vector<16xf32>
    %87 = vector.multi_reduction <add>, %86, %cst_40 [1] : vector<16x128xf32> to vector<16xf32>
    %88 = vector.shape_cast %87 : vector<16xf32> to vector<16x1xf32>
    %cst_41 = arith.constant 6.400000e+01 : f32
    %89 = vector.broadcast %cst_41 : f32 to vector<16x1xf32>
    %90 = arith.divf %88, %89 : vector<16x1xf32>
    %cst_42 = arith.constant 9.99999974E-6 : f32
    %91 = vector.broadcast %cst_42 : f32 to vector<16x1xf32>
    %92 = arith.addf %90, %91 : vector<16x1xf32>
    %93 = math.rsqrt %92 : vector<16x1xf32>
    %94 = vector.broadcast %93 : vector<16x1xf32> to vector<16x128xf32>
    %95 = arith.mulf %85, %94 : vector<16x128xf32>
    %96 = vector.broadcast %11 : vector<1x128xf32> to vector<16x128xf32>
    %97 = arith.mulf %95, %96 : vector<16x128xf32>
    %98 = vector.broadcast %12 : vector<1x128xf32> to vector<16x128xf32>
    %99 = arith.addf %97, %98 : vector<16x128xf32>
    %cst_43 = arith.constant dense<0.000000e+00> : vector<16x128xf32>
    %100 = tpu.matmul %99, %13, %cst_43 {dimension_numbers = #tpu.dot_dimension_numbers<[1], [0], [0], [1], [0, 0, 1, 1], [], []>} : vector<16x128xf32>, vector<128x128xf32>, vector<16x128xf32> -> vector<16x128xf32>
    %101 = vector.broadcast %14 : vector<1x128xf32> to vector<16x128xf32>
    %102 = arith.addf %100, %101 : vector<16x128xf32>
    %103 = tpu.iota {dimensions = array<i32: 1>} : vector<16x128xi32>
    %c5_i32 = arith.constant 5 : i32
    %104 = vector.broadcast %c5_i32 : i32 to vector<16x128xi32>
    %105 = arith.cmpi slt, %103, %104 : vector<16x128xi32>
    %cst_44 = arith.constant -1.000000e+30 : f32
    %106 = vector.broadcast %cst_44 : f32 to vector<16x128xf32>
    %107 = arith.select %105, %102, %106 : vector<16x128xi1>, vector<16x128xf32>
    %cst_45 = arith.constant dense<0xFF800000> : vector<16xf32>
    %108 = vector.multi_reduction <maximumf>, %107, %cst_45 [1] : vector<16x128xf32> to vector<16xf32>
    %109 = vector.shape_cast %108 : vector<16xf32> to vector<16x1xf32>
    %110 = vector.broadcast %109 : vector<16x1xf32> to vector<16x128xf32>
    %111 = arith.subf %107, %110 : vector<16x128xf32>
    %112 = math.exp %111 : vector<16x128xf32>
    %cst_46 = arith.constant dense<0.000000e+00> : vector<16xf32>
    %113 = vector.multi_reduction <add>, %112, %cst_46 [1] : vector<16x128xf32> to vector<16xf32>
    %114 = vector.shape_cast %113 : vector<16xf32> to vector<16x1xf32>
    %115 = math.log %114 : vector<16x1xf32>
    %116 = vector.broadcast %109 : vector<16x1xf32> to vector<16x128xf32>
    %117 = arith.cmpf oeq, %107, %116 : vector<16x128xf32>
    %c128_i32 = arith.constant 128 : i32
    %118 = vector.broadcast %c128_i32 : i32 to vector<16x128xi32>
    %119 = arith.select %117, %103, %118 : vector<16x128xi1>, vector<16x128xi32>
    %cst_47 = arith.constant dense<2147483647> : vector<16xi32>
    %120 = vector.multi_reduction <minsi>, %119, %cst_47 [1] : vector<16x128xi32> to vector<16xi32>
    %121 = vector.shape_cast %120 : vector<16xi32> to vector<16x1xi32>
    %122 = vector.broadcast %121 : vector<16x1xi32> to vector<16x128xi32>
    %123 = arith.cmpi eq, %103, %122 : vector<16x128xi32>
    %124 = vector.broadcast %109 : vector<16x1xf32> to vector<16x128xf32>
    %125 = arith.subf %107, %124 : vector<16x128xf32>
    %126 = vector.broadcast %115 : vector<16x1xf32> to vector<16x128xf32>
    %127 = arith.subf %125, %126 : vector<16x128xf32>
    %cst_48 = arith.constant 0.000000e+00 : f32
    %128 = vector.broadcast %cst_48 : f32 to vector<16x128xf32>
    %129 = arith.select %123, %127, %128 : vector<16x128xi1>, vector<16x128xf32>
    %cst_49 = arith.constant dense<0.000000e+00> : vector<16xf32>
    %130 = vector.multi_reduction <add>, %129, %cst_49 [1] : vector<16x128xf32> to vector<16xf32>
    %131 = vector.shape_cast %130 : vector<16xf32> to vector<16x1xf32>
    %132 = tpu.iota {dimensions = array<i32: 1>} : vector<16x128xi32>
    %c0_i32 = arith.constant 0 : i32
    %133 = vector.broadcast %c0_i32 : i32 to vector<16x128xi32>
    %134 = arith.cmpi eq, %132, %133 : vector<16x128xi32>
    %135 = arith.sitofp %121 : vector<16x1xi32> to vector<16x1xf32>
    %136 = vector.shape_cast %135 : vector<16x1xf32> to vector<16x1xf32>
    %137 = vector.broadcast %136 : vector<16x1xf32> to vector<16x128xf32>
    %138 = vector.shape_cast %131 : vector<16x1xf32> to vector<16x1xf32>
    %139 = vector.broadcast %138 : vector<16x1xf32> to vector<16x128xf32>
    %140 = arith.select %134, %137, %139 : vector<16x128xi1>, vector<16x128xf32>
    %c0_50 = arith.constant 0 : index
    %c0_51 = arith.constant 0 : index
    %141 = vector.load %arg5[%c0_50, %c0_51] : memref<16x128xf32, #tpu.memory_space<vmem>>, vector<16x128xf32>
    tpu.vector_store %arg5[%c0_50, %c0_51], %140 {strides = array<i32>} : memref<16x128xf32, #tpu.memory_space<vmem>>, vector<16x128xf32>,
    return
  }
  func.func @transform_0(%arg0: i32) -> (i32, i32, i32) {
    %c0_i32 = arith.constant 0 : i32
    %c0_i32_0 = arith.constant 0 : i32
    %c0_i32_1 = arith.constant 0 : i32
    return %arg0, %c0_i32, %c0_i32_0 : i32, i32, i32
  }
  func.func @transform_1(%arg0: i32) -> (i32, i32) {
    %c0_i32 = arith.constant 0 : i32
    %c0_i32_0 = arith.constant 0 : i32
    return %arg0, %c0_i32 : i32, i32
  }
  func.func @transform_2(%arg0: i32) -> (i32, i32) {
    %c0_i32 = arith.constant 0 : i32
    %c0_i32_0 = arith.constant 0 : i32
    %c0_i32_1 = arith.constant 0 : i32
    return %c0_i32, %c0_i32_0 : i32, i32
  }
  func.func @transform_3(%arg0: i32) -> (i32, i32) {
    %c0_i32 = arith.constant 0 : i32
    %c0_i32_0 = arith.constant 0 : i32
    %c0_i32_1 = arith.constant 0 : i32
    return %c0_i32, %c0_i32_0 : i32, i32
  }
  func.func @transform_4(%arg0: i32) -> (i32, i32) {
    %c0_i32 = arith.constant 0 : i32
    %c0_i32_0 = arith.constant 0 : i32
    return %arg0, %c0_i32 : i32, i32
  }
}

</mosaic_0001>

<bundles_post_ra>
// kernel: tpu_custom_call.1
= control target key start
LH: loop header
LB: loop body
LE: loop exit
PB: predicated region body
PF: predicated region fallthrough
CT: control target
= control target key end

     0   :  { %9 = vsyncpa [#allocation3], 0  ;;  %s1745_s0 = inlined_call_operand.hbm [shape: f32[16,8,16], index: 0, kind: input, shape index: {}]   ;;  %s1746_s1 = inlined_call_operand.hbm [shape: f32[16,16], index: 1, kind: input, shape index: {}]   ;;  %s1747_s2 = inlined_call_operand.hbm [shape: bf16[416,128], index: 2, kind: input, shape index: {}]   ;;  %s1748_s3 = inlined_call_operand.hbm [shape: f32[137,128], index: 3, kind: input, shape index: {}]   ;;  %s1749_s4 = inlined_call_operand.hbm [shape: f32[16,128], index: 4, kind: output, shape index: {}]  }
   0x1   :  { %10 = vsyncpa [#allocation6], 0 }
   0x2   :  { %11 = vsyncpa [#allocation9], 0 }
   0x3   :  { %12 = vsyncpa [#allocation4], 0  ;;  %s1555_s15 = smov [#allocation5]   ;;  %s1556_s17 = smov [#allocation2]  }
   0x4   :  { %s30_s16 = sshll.u32 %s1555_s15, 4  ;;  %s18_s18 = sshll.u32 %s1556_s17, 4  ;;  %s31_s16 = int_to_ptr.vmem [resolvable:$true] %s30_s16  ;;  %s19_s18 = int_to_ptr.vmem [resolvable:$true] %s18_s18 }
   0x5   :  { %s1455_s19 = scalar_lea.vmem %s31_s16, 256  ;;  %p1460_p1 = scmp.lt.s32.totalorder %s31_s16, %s31_s16 }
   0x6   :  { %p1456_p0 = scmp.ne.s32.totalorder %s31_s16, %s1455_s19  ;;  %p1461_p2 = scmp.lt.s32.totalorder %s1455_s19, %s1455_s19 }
   0x8   :  { %p1462_p3 = por %p1461_p2, %p1460_p1 }
   0xa   :  { %p1463_p4 = pnand %p1462_p3, %p1456_p0 }
   0xc   :  { %1466 = shalt.err (!%p1463_p4)
}
   0xd   :  { %s1557_s20 = smov 128   ;;  %s1558_s21 = smov 8  }
   0xe   :  { %36 = dma.hbm_to_vmem [thread:$0]  %s1746_s1, 256, %s31_s16, [#allocation6], %s1557_s20, %s1557_s20, %s1558_s21  }
   0xf   :  { %s1475_s24 = scalar_lea.vmem %s19_s18, 2048  ;;  %p1480_p6 = scmp.lt.s32.totalorder %s19_s18, %s19_s18 }
  0x10   :  { %p1476_p5 = scmp.ne.s32.totalorder %s19_s18, %s1475_s24  ;;  %p1481_p7 = scmp.lt.s32.totalorder %s1475_s24, %s1475_s24 }
  0x12   :  { %p1482_p8 = por %p1481_p7, %p1480_p6 }
  0x14   :  { %p1483_p9 = pnand %p1482_p8, %p1476_p5 }
  0x16   :  { %1486 = shalt.err (!%p1483_p9)
}
  0x17   :  { %24 = dma.hbm_to_vmem [thread:$0]  %s1745_s0, 2048, %s19_s18, [#allocation3], %s1557_s20, %s1557_s20, %s1558_s21  }
  0x18   :  { %s1559_s27 = smov [#allocation7]  }
  0x19   :  { %s42_s28 = sshll.u32 %s1559_s27, 4  ;;  %s43_s28 = int_to_ptr.vmem [resolvable:$true] %s42_s28 }
  0x1a   :  { %s1495_s29 = scalar_lea.vmem %s43_s28, 3328  ;;  %p1500_p11 = scmp.lt.s32.totalorder %s43_s28, %s43_s28 }
  0x1b   :  { %p1496_p10 = scmp.ne.s32.totalorder %s43_s28, %s1495_s29  ;;  %p1501_p12 = scmp.lt.s32.totalorder %s1495_s29, %s1495_s29 }
  0x1d   :  { %p1502_p13 = por %p1501_p12, %p1500_p11 }
  0x1f   :  { %p1503_p0 = pnand %p1502_p13, %p1496_p10 }
  0x21   :  { %1506 = shalt.err (!%p1503_p0)
}
  0x22   :  { %s1560_s1 = smov 64   ;;  %s1561_s30 = smov 4  }
  0x23   :  { %48 = dma.hbm_to_vmem [thread:$0]  %s1747_s2, 3328, %s43_s28, [#allocation6], %s1560_s1, %s1560_s1, %s1561_s30  }
  0x24   :  { %s1562_s7 = smov [#allocation8]  }
  0x25   :  { %s54_s8 = sshll.u32 %s1562_s7, 4  ;;  %s55_s8 = int_to_ptr.vmem [resolvable:$true] %s54_s8 }
  0x26   :  { %s1515_s0 = scalar_lea.vmem %s55_s8, 2304  ;;  %p1520_p2 = scmp.lt.s32.totalorder %s55_s8, %s55_s8 }
  0x27   :  { %p1516_p1 = scmp.ne.s32.totalorder %s55_s8, %s1515_s0  ;;  %p1521_p3 = scmp.lt.s32.totalorder %s1515_s0, %s1515_s0 }
  0x29   :  { %p1522_p4 = por %p1521_p3, %p1520_p2 }
  0x2b   :  { %p1523_p5 = pnand %p1522_p4, %p1516_p1 }
  0x2d   :  { %1526 = shalt.err (!%p1523_p5)
}
  0x2e   :  { %60 = dma.hbm_to_vmem [thread:$0]  %s1748_s3, 2304, %s55_s8, [#allocation9], %s1557_s20, %s1557_s20, %s1558_s21  }
  0x2f   :  { %1547 = dma.done.wait [#allocation3], 2048  }
  0x30   :  { %1548 = vsyncadd [#allocation3], 4294965248 }
  0x31   :  { %1549 = dma.done.wait [#allocation6], 3584  }
  0x32   :  { %1550 = vsyncadd [#allocation6], 4294963712 }
  0x33   :  { %1551 = dma.done.wait [#allocation9], 2304  }
  0x34   :  { %1552 = vsyncadd [#allocation9], 4294964992  ;;  %v1563_v0 = vmov 6   ;;  %v1405_v1 = vld [vmem:[#allocation7] sm:$0xff]   ;;  %v151_v2 = vld [vmem:[#allocation2] sm:$0xff]  ;;  %vm187_vm0 = vcmask 130048  }
  0x35   :  { %1404 = vset.pattern.permute.xlu1 %v1563_v0  ;;  %1403 = vset.pattern.permute.xlu0 %v1563_v0  ;;  %v152_v3 = vld [vmem:[#allocation2 + $0x8] sm:$0xff]  ;;  %v153_v4 = vld [vmem:[#allocation2 + $0x10] sm:$0xff]  ;;  %v154_v6 = vld [vmem:[#allocation2 + $0x18] sm:$0xff]  ;;  %v1564_v27 = vmov 0.0   ;;  %vm1565_vm1 = vmmov 0   ;;  %vm569_vm2 = vcmask 1041409  }
  0x36   :  { %1272 = vmatprep.subr.bf16.mxu0 %v1405_v1  ;;  %v169_v5 = vpack.c.bf16 %v152_v3, %v151_v2  ;;  %v155_v7 = vld [vmem:[#allocation2 + $0x20] sm:$0xff]  ;;  %v156_v8 = vld [vmem:[#allocation2 + $0x28] sm:$0xff]  ;;  %327 = vperm.xlu0 %1403, %v151_v2   ;;  %v170_v9 = vpack.c.bf16 %v154_v6, %v153_v4  ;;  %v157_v12 = vld [vmem:[#allocation2 + $0x30] sm:$0xff]  ;;  %vm571_vm3 = vcmask 1042434   ;;  %vm573_vm4 = vcmask 1043459   ;;  %s1566_s2 = smov [#allocation10]  }
  0x37   :  { %1273 = vmatpush3.bf16.msra.mxu0 %v1405_v1  ;;  %v171_v10 = vpack.c.bf16 %v156_v8, %v155_v7  ;;  %v159_v11 = vld [vmem:[#allocation2 + $0x40] sm:$0xff]  ;;  %v158_v13 = vld [vmem:[#allocation2 + $0x38] sm:$0xff]  ;;  %v160_v14 = vld [vmem:[#allocation2 + $0x48] sm:$0xff]  ;;  %1290 = vmatprep.subr.bf16.mxu1 %v1564_v27  ;;  %vm575_vm5 = vcmask 1044484   ;;  %vm577_vm6 = vcmask 1045509   ;;  %vm579_vm7 = vcmask 1046534  }
  0x38   :  { %1274 = vmatprep.mubr.msk.bf16.mxu0 %vm187_vm0, %v169_v5  ;;  %367 = vperm.xlu1 %1404, %v159_v11   ;;  %v161_v15 = vld [vmem:[#allocation2 + $0x50] sm:$0xff]  ;;  %v172_v16 = vpack.c.bf16 %v158_v13, %v157_v12  ;;  %v173_v17 = vpack.c.bf16 %v160_v14, %v159_v11  ;;  %v162_v18 = vld [vmem:[#allocation2 + $0x58] sm:$0xff]  ;;  %v163_v19 = vld [vmem:[#allocation2 + $0x60] sm:$0xff]  ;;  %vm581_vm8 = vcmask 1047559   ;;  %s1158_s3 = sshll.u32 %s1566_s2, 4  ;;  %s1159_s3 = int_to_ptr.vmem [resolvable:$true] %s1158_s3 }
  0x39   :  { %v164_v20 = vld [vmem:[#allocation2 + $0x68] sm:$0xff]  ;;  %v174_v21 = vpack.c.bf16 %v162_v18, %v161_v15  ;;  %v165_v23 = vld [vmem:[#allocation2 + $0x70] sm:$0xff]  ;;  %v166_v24 = vld [vmem:[#allocation2 + $0x78] sm:$0xff]  ;;  %1310 = vmatprep.subr.bf16.mxu0 %v1564_v27  ;;  %1306 = vmatprep.mubr.msk.bf16.mxu1 %vm1565_vm1, %v1564_v27  ;;  %s1527_s11 = scalar_lea.vmem %s1159_s3, 256  ;;  %p1532_p7 = scmp.lt.s32.totalorder %s1159_s3, %s1159_s3 }
  0x3a   :  { %1275 = vmatmul.mubr.msk.bf16.vlgmr.msra.gmra.mxu0 %vm187_vm0, %v170_v9  ;;  %332 = vperm.xlu0 %1403, %v152_v3   ;;  %v175_v22 = vpack.c.bf16 %v164_v20, %v163_v19  ;;  %v176_v25 = vpack.c.bf16 %v166_v24, %v165_v23  ;;  %v1406_v26 = vld [vmem:[#allocation7 + $0x40] sm:$0xff]   ;;  %v1407_v28 = vld [vmem:[#allocation7 + $0x38] sm:$0xff]   ;;  %v1408_v29 = vld [vmem:[#allocation7 + $0x30] sm:$0xff]   ;;  %p1528_p6 = scmp.ne.s32.totalorder %s1159_s3, %s1527_s11  ;;  %p1533_p8 = scmp.lt.s32.totalorder %s1527_s11, %s1527_s11 }
  0x3b   :  { %1278 = vmatprep.mubr.msk.bf16.mxu0 %vm187_vm0, %v171_v10  ;;  %1291 = vmatpush3.bf16.msra.mxu1 %v1406_v26  ;;  %v1409_v30 = vld [vmem:[#allocation7 + $0x28] sm:$0xff]   ;;  %v1410_v31 = vld [vmem:[#allocation7 + $0x20] sm:$0xff]   ;;  %v1411_v32 = vld [vmem:[#allocation7 + $0x18] sm:$0xff]  }
  0x3c   :  { %372 = vperm.xlu1 %1404, %v160_v14   ;;  %1292 = vmatprep.subr.bf16.mxu1 %v1564_v27  ;;  %v1412_v33 = vld [vmem:[#allocation7 + $0x10] sm:$0xff]   ;;  %v1413_v34 = vld [vmem:[#allocation7 + $0x8] sm:$0xff]   ;;  %v1415_v36 = vld [vmem:[#allocation7 + $0x80] sm:$0xff]   ;;  %p1534_p9 = por %p1533_p8, %p1532_p7 }
  0x3d   :  { %v1414_v35 = vld [vmem:[#allocation7 + $0x88] sm:$0xff]   ;;  %v1416_v37 = vld [vmem:[#allocation7 + $0x78] sm:$0xff]   ;;  %v1417_v38 = vld [vmem:[#allocation7 + $0x70] sm:$0xff]  }
  0x3e   :  { %337 = vperm.xlu0 %1403, %v153_v4   ;;  %1311 = vmatpush3.bf16.msra.mxu0 %v1414_v35  ;;  %v1418_v39 = vld [vmem:[#allocation7 + $0x68] sm:$0xff]   ;;  %v1419_v40 = vld [vmem:[#allocation7 + $0x60] sm:$0xff]   ;;  %v1643_v46 = vld [vmem:[#allocation8] ss:$0 sm:$0xff]  ;;  %p1535_p10 = pnand %p1534_p9, %p1528_p6 }
  0x3f   :  { %1293 = vmatpush3.bf16.msra.mxu1 %v1407_v28  ;;  %1312 = vmatprep.subr.bf16.mxu0 %v1564_v27 }
  0x40   :  { %377 = vperm.xlu1 %1404, %v161_v15   ;;  %1294 = vmatprep.subr.bf16.mxu1 %v1564_v27 }
  0x42   :  { %1279 = vmatmul.mubr.msk.bf16.gmra.mxu0 %vm187_vm0, %v172_v16  ;;  %342 = vperm.xlu0 %1403, %v154_v6  }
  0x43   :  { %1282 = vmatprep.mubr.msk.bf16.mxu0 %vm187_vm0, %v173_v17  ;;  %1295 = vmatpush3.bf16.msra.mxu1 %v1408_v29 }
  0x44   :  { %382 = vperm.xlu1 %1404, %v162_v18   ;;  %1296 = vmatprep.subr.bf16.mxu1 %v1564_v27 }
  0x45   :  { %1313 = vmatpush3.bf16.msra.mxu0 %v1415_v36 }
  0x46   :  { %347 = vperm.xlu0 %1403, %v155_v7   ;;  %1314 = vmatprep.subr.bf16.mxu0 %v1564_v27 }
  0x47   :  { %1297 = vmatpush3.bf16.msra.mxu1 %v1409_v30 }
  0x48   :  { %387 = vperm.xlu1 %1404, %v163_v19   ;;  %1298 = vmatprep.subr.bf16.mxu1 %v1564_v27 }
  0x49   :  { %1315 = vmatpush3.bf16.msra.mxu0 %v1416_v37 }
  0x4a   :  { %1283 = vmatmul.mubr.msk.bf16.gmra.mxu0 %vm187_vm0, %v174_v21  ;;  %352 = vperm.xlu0 %1403, %v156_v8  }
  0x4b   :  { %1286 = vmatprep.mubr.msk.bf16.mxu0 %vm187_vm0, %v175_v22  ;;  %1299 = vmatpush3.bf16.msra.mxu1 %v1410_v31 }
  0x4c   :  { %392 = vperm.xlu1 %1404, %v164_v20   ;;  %1300 = vmatprep.subr.bf16.mxu1 %v1564_v27 }
  0x4d   :  { %1316 = vmatprep.subr.bf16.mxu0 %v1564_v27 }
  0x4e   :  { %357 = vperm.xlu0 %1403, %v157_v12   ;;  %1317 = vmatpush3.bf16.msra.mxu0 %v1417_v38 }
  0x4f   :  { %1301 = vmatpush3.bf16.msra.mxu1 %v1411_v32  ;;  %1318 = vmatprep.subr.bf16.mxu0 %v1564_v27 }
  0x50   :  { %397 = vperm.xlu1 %1404, %v165_v23   ;;  %1302 = vmatprep.subr.bf16.mxu1 %v1564_v27 }
  0x52   :  { %1287 = vmatmul.mubr.msk.bf16.gmra.mxu0 %vm187_vm0, %v176_v25  ;;  %362 = vperm.xlu0 %1403, %v158_v13  }
  0x53   :  { %1303 = vmatpush3.bf16.msra.mxu1 %v1412_v33  ;;  %1326 = vmatprep.mubr.msk.bf16.mxu0 %vm1565_vm1, %v1564_v27 }
  0x54   :  { %402 = vperm.xlu1 %1404, %v166_v24   ;;  %1304 = vmatprep.subr.bf16.mxu1 %v1564_v27 }
  0x55   :  { %1319 = vmatpush3.bf16.msra.mxu0 %v1418_v39 }
  0x56   :  { %1320 = vmatprep.subr.bf16.mxu0 %v1564_v27 }
  0x57   :  { %1305 = vmatpush3.bf16.msra.mxu1 %v1413_v34 }
  0x58   :  { %1330 = vmatprep.subr.bf16.mxu1 %v1564_v27 }
  0x59   :  { %1321 = vmatpush3.bf16.msra.mxu0 %v1419_v40 }
  0x5a   :  { %1322 = vmatprep.subr.bf16.mxu0 %v1564_v27 }
  0xb1   :  { %v328_v41 = vpop.permute.xlu0 %327 }
  0xb3   :  { %v1641_v45 = vpop.permute.xlu1 %367 }
  0xb5   :  { %v333_v42 = vpop.permute.xlu0 %332 }
  0xb7   :  { %v1645_v49 = vpop.permute.xlu1 %372 }
  0xb9   :  { %v338_v43 = vpop.permute.xlu0 %337 }
  0xbb   :  { %v1650_v60 = vpop.permute.xlu1 %377 }
  0xbd   :  { %v343_v44 = vpop.permute.xlu0 %342 }
  0xbf   :  { %v1655_v16 = vpop.permute.xlu1 %382 }
  0xc1   :  { %v348_v47 = vpop.permute.xlu0 %347 }
  0xc5   :  { %v353_v55 = vpop.permute.xlu0 %352 }
  0xc9   :  { %v358_v10 = vpop.permute.xlu0 %357 }
  0xcd   :  { %v363_v38 = vpop.permute.xlu0 %362 }
  0xfa   :  { %v1276_v48 = vpop.f32.mrf.mxu0 }
  0xfb   :  { %v255_v50 = vadd.f32 %v1276_v48, %v1643_v46 }
  0xfc   :  { %v246_v51 = vpop.f32.mrf.mxu0 }
  0xfd   :  { %v311_v52 = vmax.f32 %v255_v50, 0.0  ;;  %v247_v53 = vadd.f32 %v1643_v46, %v246_v51 }
  0xfe   :  { %v1277_v54 = vpop.f32.mrf.mxu0 }
  0xff   :  { %v407_v56 = vmul.f32 %v338_v43, %v311_v52  ;;  %v309_v57 = vmax.f32 %v247_v53, 0.0  ;;  %v258_v58 = vadd.f32 %v1277_v54, %v1643_v46 }
 0x100   :  { %v249_v59 = vpop.f32.mrf.mxu0 }
 0x101   :  { %v433_v61 = vrot.slane %v407_v56, 4  ;;  %v405_v62 = vmul.f32 %v328_v41, %v309_v57  ;;  %v312_v63 = vmax.f32 %v258_v58, 0.0  ;;  %v250_v0 = vadd.f32 %v1643_v46, %v249_v59 }
 0x102   :  { %v1280_v1 = vpop.f32.mrf.mxu0 }
 0x103   :  { %v434_v2 = vadd.f32 %v433_v61, %v407_v56  ;;  %v421_v3 = vrot.slane %v405_v62, 4  ;;  %v408_v4 = vmul.f32 %v343_v44, %v312_v63  ;;  %v310_v5 = vmax.f32 %v250_v0, 0.0  ;;  %v1659_v44 = vpop.permute.xlu1 %387 }
 0x104   :  { %v271_v6 = vadd.f32 %v1280_v1, %v1643_v46  ;;  %v262_v7 = vpop.f32.mrf.mxu0 }
 0x105   :  { %v435_v8 = vrot.slane %v434_v2, 2  ;;  %v422_v9 = vadd.f32 %v421_v3, %v405_v62  ;;  %v439_v11 = vrot.slane %v408_v4, 4  ;;  %v406_v12 = vmul.f32 %v333_v42, %v310_v5 }
 0x106   :  { %v315_v13 = vmax.f32 %v271_v6, 0.0  ;;  %v263_v14 = vadd.f32 %v1643_v46, %v262_v7  ;;  %v1281_v15 = vpop.f32.mrf.mxu0 }
 0x107   :  { %v436_v17 = vadd.f32 %v435_v8, %v434_v2  ;;  %v423_v18 = vrot.slane %v422_v9, 2  ;;  %v440_v19 = vadd.f32 %v439_v11, %v408_v4  ;;  %v427_v20 = vrot.slane %v406_v12, 4  ;;  %v1662_v2 = vpop.permute.xlu1 %392 }
 0x108   :  { %v411_v21 = vmul.f32 %v358_v10, %v315_v13  ;;  %v313_v22 = vmax.f32 %v263_v14, 0.0  ;;  %v274_v23 = vadd.f32 %v1281_v15, %v1643_v46  ;;  %v265_v24 = vpop.f32.mrf.mxu0 }
 0x109   :  { %v424_v25 = vadd.f32 %v423_v18, %v422_v9  ;;  %v441_v26 = vrot.slane %v440_v19, 2  ;;  %v428_v28 = vadd.f32 %v427_v20, %v406_v12  ;;  %v266_v32 = vadd.f32 %v1643_v46, %v265_v24 }
 0x10a   :  { %v457_v29 = vrot.slane %v411_v21, 4  ;;  %v409_v30 = vmul.f32 %v348_v47, %v313_v22  ;;  %v316_v31 = vmax.f32 %v274_v23, 0.0  ;;  %v1284_v33 = vpop.f32.mrf.mxu0  ;;  %v437_v34 = vrot.slane %v436_v17, 1 }
 0x10b   :  { %v425_v35 = vrot.slane %v424_v25, 1  ;;  %v442_v36 = vadd.f32 %v441_v26, %v440_v19  ;;  %v429_v37 = vrot.slane %v428_v28, 2  ;;  %v314_v42 = vmax.f32 %v266_v32, 0.0 }
 0x10c   :  { %v458_v39 = vadd.f32 %v457_v29, %v411_v21  ;;  %v445_v40 = vrot.slane %v409_v30, 4  ;;  %v412_v41 = vmul.f32 %v363_v38, %v316_v31  ;;  %v278_v43 = vpop.f32.mrf.mxu0  ;;  %v438_v53 = vadd.f32 %v437_v34, %v436_v17 }
 0x10d   :  { %v443_v48 = vrot.slane %v442_v36, 1  ;;  %v430_v50 = vadd.f32 %v429_v37, %v428_v28  ;;  %v410_v47 = vmul.f32 %v353_v55, %v314_v42  ;;  %v426_v54 = vadd.f32 %v425_v35, %v424_v25 }
 0x10e   :  { %v446_v51 = vadd.f32 %v445_v40, %v409_v30  ;;  %v1285_v52 = vpop.f32.mrf.mxu0  ;;  %v459_v56 = vrot.slane %v458_v39, 2  ;;  %v463_v57 = vrot.slane %v412_v41, 4  ;;  %v287_v61 = vadd.f32 %v1284_v33, %v1643_v46 }
 0x10f   :  { %v451_v58 = vrot.slane %v410_v47, 4  ;;  %v444_v62 = vadd.f32 %v443_v48, %v442_v36  ;;  %v431_v63 = vrot.slane %v430_v50, 1  ;;  %v519_v3 = vpack.c.bf16 %v438_v53, %v438_v53 }
 0x110   :  { %v281_v59 = vpop.f32.mrf.mxu0  ;;  %v447_v0 = vrot.slane %v446_v51, 2  ;;  %v319_v4 = vmax.f32 %v287_v61, 0.0  ;;  %v279_v5 = vadd.f32 %v1643_v46, %v278_v43  ;;  %v517_v55 = vpack.c.bf16 %v426_v54, %v426_v54 }
 0x111   :  { %v1665_v6 = vadd.f32 %v459_v56, %v458_v39  ;;  %v464_v7 = vadd.f32 %v463_v57, %v412_v41  ;;  %v452_v8 = vadd.f32 %v451_v58, %v410_v47  ;;  %v290_v11 = vadd.f32 %v1285_v52, %v1643_v46 }
 0x112   :  { %v1288_v1 = vpop.f32.mrf.mxu0  ;;  %v415_v9 = vmul.f32 %v1650_v60, %v319_v4  ;;  %v317_v10 = vmax.f32 %v279_v5, 0.0  ;;  %v520_v13 = vpack.c.bf16 %v444_v62, %v444_v62  ;;  %v432_v14 = vadd.f32 %v431_v63, %v430_v50  ;;  %v398_v60 = vpop.permute.xlu1 %397 }
 0x113   :  { %v448_v15 = vadd.f32 %v447_v0, %v446_v51  ;;  %v1669_v17 = vunpack.c.l.b16 %v519_v3  ;;  %v320_v20 = vmax.f32 %v290_v11, 0.0  ;;  %v1672_v21 = vunpack.c.l.b16 %v517_v55 }
 0x114   :  { %v294_v12 = vpop.f32.mrf.mxu0  ;;  %v481_v18 = vrot.slane %v415_v9, 4  ;;  %v413_v19 = vmul.f32 %v1641_v45, %v317_v10  ;;  %v461_v22 = vrot.slane %v1665_v6, 1  ;;  %v465_v23 = vrot.slane %v464_v7, 2 }
 0x115   :  { %v453_v24 = vrot.slane %v452_v8, 2  ;;  %v416_v28 = vmul.f32 %v1655_v16, %v320_v20  ;;  %v282_v29 = vadd.f32 %v1643_v46, %v281_v59  ;;  %v1677_v31 = vunpack.c.l.b16 %v520_v13 }
 0x116   :  { %v482_v25 = vadd.f32 %v481_v18, %v415_v9  ;;  %v469_v26 = vrot.slane %v413_v19, 4  ;;  %v1289_v30 = vpop.f32.mrf.mxu0  ;;  %v518_v32 = vpack.c.bf16 %v432_v14, %v432_v14  ;;  %v449_v33 = vrot.slane %v448_v15, 1  ;;  %v403_v54 = vpop.permute.xlu1 %402 }
 0x117   :  { %v303_v45 = vadd.f32 %v1288_v1, %v1643_v46  ;;  %v487_v36 = vrot.slane %v416_v28, 4  ;;  %v318_v37 = vmax.f32 %v282_v29, 0.0  ;;  %v1680_v38 = vadd.f32 %v465_v23, %v464_v7 }
 0x118   :  { %v483_v34 = vrot.slane %v482_v25, 2  ;;  %v470_v35 = vadd.f32 %v469_v26, %v413_v19  ;;  %v295_v40 = vadd.f32 %v1643_v46, %v294_v12  ;;  %v306_v16 = vadd.f32 %v1289_v30, %v1643_v46  ;;  %v297_v50 = vpop.f32.mrf.mxu0 }
 0x119   :  { %v323_v39 = vmax.f32 %v303_v45, 0.0  ;;  %v454_v41 = vadd.f32 %v453_v24, %v452_v8  ;;  %v488_v43 = vadd.f32 %v487_v36, %v416_v28  ;;  %v414_v48 = vmul.f32 %v1645_v49, %v318_v37 }
 0x11a   :  { %v471_v42 = vrot.slane %v470_v35, 2  ;;  %v554_v51 = vunpack.c.l.b16 %v518_v32  ;;  %v321_v52 = vmax.f32 %v295_v40, 0.0  ;;  %v324_v53 = vmax.f32 %v306_v16, 0.0 }
 0x11b   :  { %v419_v47 = vmul.f32 %v398_v60, %v323_v39  ;;  %v484_v56 = vadd.f32 %v483_v34, %v482_v25  ;;  %v489_v58 = vrot.slane %v488_v43, 2  ;;  %v475_v59 = vrot.slane %v414_v48, 4 }
 0x11c   :  { %v472_v57 = vadd.f32 %v471_v42, %v470_v35  ;;  %v417_v62 = vmul.f32 %v1659_v44, %v321_v52  ;;  %v420_v63 = vmul.f32 %v403_v54, %v324_v53  ;;  %v298_v0 = vadd.f32 %v1643_v46, %v297_v50 }
 0x11d   :  { %v505_v61 = vrot.slane %v419_v47, 4  ;;  %v455_v1 = vrot.slane %v454_v41, 1  ;;  %v490_v49 = vadd.f32 %v489_v58, %v488_v43  ;;  %v476_v4 = vadd.f32 %v475_v59, %v414_v48 }
 0x11e   :  { %v473_v3 = vrot.slane %v472_v57, 1  ;;  %v493_v55 = vrot.slane %v417_v62, 4  ;;  %v511_v7 = vrot.slane %v420_v63, 4  ;;  %v322_v8 = vmax.f32 %v298_v0, 0.0 }
 0x11f   :  { %v506_v5 = vadd.f32 %v505_v61, %v419_v47  ;;  %v450_v9 = vadd.f32 %v449_v33, %v448_v15  ;;  %v485_v10 = vrot.slane %v484_v56, 1  ;;  %v491_v11 = vrot.slane %v490_v49, 1 }
 0x120   :  { %v477_v12 = vrot.slane %v476_v4, 2  ;;  %v494_v14 = vadd.f32 %v493_v55, %v417_v62  ;;  %v512_v44 = vadd.f32 %v511_v7, %v420_v63  ;;  %v418_v18 = vmul.f32 %v1662_v2, %v322_v8 }
 0x121   :  { %v507_v13 = vrot.slane %v506_v5, 2  ;;  %v467_v46 = vrot.slane %v1680_v38, 1  ;;  %v456_v19 = vadd.f32 %v455_v1, %v454_v41  ;;  %v474_v20 = vadd.f32 %v473_v3, %v472_v57 }
 0x122   :  { %v478_v23 = vadd.f32 %v477_v12, %v476_v4  ;;  %v495_v60 = vrot.slane %v494_v14, 2  ;;  %v513_v25 = vrot.slane %v512_v44, 2  ;;  %v499_v26 = vrot.slane %v418_v18, 4 }
 0x123   :  { %v508_v24 = vadd.f32 %v507_v13, %v506_v5  ;;  %v570_v15 = vsel %vm569_vm2, %v554_v51, %v1672_v21  ;;  %v521_v28 = vpack.c.bf16 %v450_v9, %v450_v9  ;;  %v486_v29 = vadd.f32 %v485_v10, %v484_v56 }
 0x124   :  { %v479_v30 = vrot.slane %v478_v23, 1  ;;  %v492_v32 = vadd.f32 %v491_v11, %v490_v49  ;;  %v496_v33 = vadd.f32 %v495_v60, %v494_v14  ;;  %v514_v45 = vadd.f32 %v513_v25, %v512_v44  ;;  %v167_v60 = vld [vmem:[#allocation5] sm:$0xff]  ;;  %v168_v25 = vld [vmem:[#allocation5 + $0x8] sm:$0xff] }
 0x125   :  { %v500_v2 = vadd.f32 %v499_v26, %v418_v18  ;;  %v522_v34 = vpack.c.bf16 %v456_v19, %v456_v19  ;;  %v525_v35 = vpack.c.bf16 %v474_v20, %v474_v20  ;;  %v509_v37 = vrot.slane %v508_v24, 1  ;;  %v1422_v26 = vld [vmem:[#allocation7 + $0x50] sm:$0xff]  }
 0x126   :  { %v480_v36 = vadd.f32 %v479_v30, %v478_v23  ;;  %v462_v39 = vadd.f32 %v461_v22, %v1665_v6  ;;  %v497_v40 = vrot.slane %v496_v33, 1  ;;  %v515_v16 = vrot.slane %v514_v45, 1  ;;  %v1420_v23 = vld [vmem:[#allocation7 + $0x48] sm:$0xff]  }
 0x127   :  { %v501_v41 = vrot.slane %v500_v2, 2  ;;  %v468_v21 = vadd.f32 %v467_v46, %v1680_v38  ;;  %v527_v42 = vpack.c.bf16 %v486_v29, %v486_v29  ;;  %v572_v48 = vsel %vm571_vm3, %v1669_v17, %v570_v15 }
 0x128   :  { %v526_v43 = vpack.c.bf16 %v480_v36, %v480_v36  ;;  %v557_v50 = vunpack.c.l.b16 %v521_v28  ;;  %v528_v51 = vpack.c.bf16 %v492_v32, %v492_v32  ;;  %v498_v47 = vadd.f32 %v497_v40, %v496_v33  ;;  %v1182_v28 = vld [vmem:[#allocation8 + $0x1] ss:$0 sm:$0xff] }
 0x129   :  { %v502_v52 = vadd.f32 %v501_v41, %v500_v2  ;;  %v558_v53 = vunpack.c.l.b16 %v522_v34  ;;  %v561_v54 = vunpack.c.l.b16 %v525_v35  ;;  %v510_v57 = vadd.f32 %v509_v37, %v508_v24  ;;  %v1421_v24 = vld [vmem:[#allocation7 + $0x58] sm:$0xff]  }
 0x12a   :  { %v562_v56 = vunpack.c.l.b16 %v526_v43  ;;  %v529_v58 = vpack.c.bf16 %v498_v47, %v498_v47  ;;  %v516_v6 = vadd.f32 %v515_v16, %v514_v45  ;;  %v574_v59 = vsel %vm573_vm4, %v1677_v31, %v572_v48  ;;  %1323 = vmatpush3.bf16.msra.mxu0 %v1421_v24 }
 0x12b   :  { %v503_v22 = vrot.slane %v502_v52, 1  ;;  %v523_v38 = vpack.c.bf16 %v462_v39, %v462_v39  ;;  %v563_v61 = vunpack.c.l.b16 %v527_v42  ;;  %v524_v17 = vpack.c.bf16 %v468_v21, %v468_v21  ;;  %1324 = vmatprep.subr.bf16.mxu0 %v1564_v27  ;;  %v1201_v21 = vld [vmem:[#allocation8 + $0x2] ss:$0 sm:$0xff] }
 0x12c   :  { %v583_v62 = vsel %vm569_vm2, %v562_v56, %v561_v54  ;;  %v564_v63 = vunpack.c.l.b16 %v528_v51  ;;  %v531_v1 = vpack.c.bf16 %v510_v57, %v510_v57  ;;  %v565_v3 = vunpack.c.l.b16 %v529_v58  ;;  %v1423_v56 = vld [vmem:[#allocation7 + $0xc8] sm:$0xff]  }
 0x12d   :  { %v504_v0 = vadd.f32 %v503_v22, %v502_v52  ;;  %v576_v49 = vsel %vm575_vm5, %v557_v50, %v574_v59  ;;  %v584_v4 = vsel %vm571_vm3, %v563_v61, %v583_v62  ;;  %v532_v5 = vpack.c.bf16 %v516_v6, %v516_v6 }
 0x12e   :  { %v578_v7 = vsel %vm577_vm6, %v558_v53, %v576_v49  ;;  %v585_v31 = vsel %vm573_vm4, %v564_v63, %v584_v4  ;;  %v559_v8 = vunpack.c.l.b16 %v523_v38  ;;  %v567_v10 = vunpack.c.l.b16 %v531_v1  ;;  %1325 = vmatpush3.bf16.msra.mxu0 %v1422_v26  ;;  %v1425_v49 = vld [vmem:[#allocation7 + $0xb8] sm:$0xff]   ;;  %v1426_v4 = vld [vmem:[#allocation7 + $0xb0] sm:$0xff]  }
 0x12f   :  { %v530_v55 = vpack.c.bf16 %v504_v0, %v504_v0  ;;  %v586_v12 = vsel %vm575_vm5, %v565_v3, %v585_v31  ;;  %v560_v13 = vunpack.c.l.b16 %v524_v17  ;;  %v568_v14 = vunpack.c.l.b16 %v532_v5  ;;  %1336 = vmatprep.subr.bf16.mxu0 %v1564_v27  ;;  %v1424_v3 = vld [vmem:[#allocation7 + $0xc0] sm:$0xff]   ;;  %v1427_v5 = vld [vmem:[#allocation7 + $0xa8] sm:$0xff]   ;;  %v1430_v31 = vld [vmem:[#allocation7 + $0x90] sm:$0xff]  }
 0x130   :  { %v580_v11 = vsel %vm579_vm7, %v559_v8, %v578_v7  ;;  %v683_v15 = vpack.c.bf16 %v168_v25, %v167_v60  ;;  %v832_v57 = vlaneseq  ;;  %v1429_v7 = vld [vmem:[#allocation7 + $0x98] sm:$0xff]   ;;  %v1204_v26 = vld [vmem:[#allocation8 + $0x5] ss:$0 sm:$0xff] }
 0x131   :  { %v566_v9 = vunpack.c.l.b16 %v530_v55  ;;  %v582_v46 = vsel %vm581_vm8, %v560_v13, %v580_v11  ;;  %v1428_v55 = vld [vmem:[#allocation7 + $0xa0] sm:$0xff]  }
 0x132   :  { %v1716_v58 = vand.u32 127, %v832_v57  ;;  %v140_v57 = vld [vmem:[#allocation8 + $0x38] sm:$0xff] }
 0x133   :  { %v587_v44 = vsel %vm577_vm6, %v566_v9, %v586_v12 }
 0x134   :  { %v588_v18 = vsel %vm579_vm7, %v567_v10, %v587_v44  ;;  %vm834_vm9 = vcmp.lt.s32.totalorder %v1716_v58, 64  ;;  %vm1083_vm10 = vcmp.lt.s32.totalorder %v1716_v58, 5 }
 0x135   :  { %v589_v19 = vsel %vm581_vm8, %v568_v14, %v588_v18  ;;  %v1202_v18 = vld [vmem:[#allocation8 + $0x3] ss:$0 sm:$0xff] }
 0x136   :  { %v590_v20 = vpack.c.b16 %v589_v19, %v582_v46 }
 0x138   :  { %1307 = vmatmul.mubr.bf16.vlgmr.msra.gmra.mxu1 %v590_v20 }
 0x139   :  { %1332 = vmatprep.mubr.msk.bf16.mxu1 %vm1565_vm1, %v1564_v27  ;;  %1331 = vmatpush3.bf16.msra.mxu1 %v1420_v23  ;;  %v1203_v23 = vld [vmem:[#allocation8 + $0x4] ss:$0 sm:$0xff] }
 0x140   :  { %1333 = vmatmul.mubr.msk.bf16.vlgmr.msra.gmra.mxu1 %vm187_vm0, %v683_v15 }
 0x1f8   :  { %v674_v29 = vpop.f32.mrf.mxu1 }
 0x1f9   :  { %v675_v32 = vadd.f32 %v1182_v28, %v674_v29 }
 0x1fa   :  { %v1308_v30 = vpop.f32.mrf.mxu1 }
 0x1fb   :  { %v681_v34 = vmax.f32 %v675_v32, 0.0 }
 0x1fc   :  { %v677_v33 = vpop.f32.mrf.mxu1 }
 0x1fd   :  { %v678_v45 = vadd.f32 %v1182_v28, %v677_v33 }
 0x1fe   :  { %v1309_v2 = vpop.f32.mrf.mxu1 }
 0x1ff   :  { %v682_v35 = vmax.f32 %v678_v45, 0.0 }
 0x200   :  { %v817_v37 = vpop.f32.mrf.mxu1 }
 0x201   :  { %v684_v36 = vpack.c.bf16 %v682_v35, %v681_v34  ;;  %v149_v34 = vld [vmem:[#allocation8 + $0x80] sm:$0xff]  ;;  %v148_v35 = vld [vmem:[#allocation8 + $0x78] sm:$0xff] }
 0x202   :  { %v1334_v39 = vpop.f32.mrf.mxu1  ;;  %1356 = vmatprep.subr.mxu1 %v149_v34 }
 0x203   :  { %1327 = vmatmul.mubr.bf16.vlgmr.msra.gmra.mxu0 %v684_v36  ;;  %1357 = vmatpush3.msra.mxu1 %v149_v34 }
 0x204   :  { %1352 = vmatprep.mubr.msk.bf16.mxu0 %vm1565_vm1, %v1564_v27  ;;  %v820_v40 = vpop.f32.mrf.mxu1  ;;  %1337 = vmatpush3.bf16.msra.mxu0 %v1423_v56  ;;  %v141_v56 = vld [vmem:[#allocation8 + $0x40] sm:$0xff]  ;;  %vm1146_vm1 = vcmp.eq.s32.totalorder %v1716_v58, 0 }
 0x205   :  { %1338 = vmatprep.subr.bf16.mxu0 %v1564_v27  ;;  %1358 = vmatprep.subr.mxu1 %v148_v35 }
 0x206   :  { %v1335_v16 = vpop.f32.mrf.mxu1  ;;  %1359 = vmatpush3.msra.mxu1 %v148_v35 }
 0x208   :  { %1339 = vmatpush3.bf16.msra.mxu0 %v1424_v3 }
 0x209   :  { %1340 = vmatprep.subr.bf16.mxu0 %v1564_v27 }
 0x20c   :  { %1341 = vmatpush3.bf16.msra.mxu0 %v1425_v49 }
 0x20d   :  { %1342 = vmatprep.subr.bf16.mxu0 %v1564_v27 }
 0x210   :  { %1343 = vmatpush3.bf16.msra.mxu0 %v1426_v4 }
 0x211   :  { %1344 = vmatprep.subr.bf16.mxu0 %v1564_v27 }
 0x214   :  { %1345 = vmatpush3.bf16.msra.mxu0 %v1427_v5  ;;  %v1213_v5 = vld [vmem:[#allocation8 + $0x6] ss:$0 sm:$0xff] }
 0x215   :  { %1346 = vmatprep.subr.bf16.mxu0 %v1564_v27 }
 0x218   :  { %1347 = vmatpush3.bf16.msra.mxu0 %v1428_v55 }
 0x219   :  { %1348 = vmatprep.subr.bf16.mxu0 %v1564_v27 }
 0x21c   :  { %1349 = vmatpush3.bf16.msra.mxu0 %v1429_v7  ;;  %v1214_v7 = vld [vmem:[#allocation8 + $0x7] ss:$0 sm:$0xff] }
 0x21d   :  { %1350 = vmatprep.subr.bf16.mxu0 %v1564_v27 }
 0x220   :  { %1351 = vmatpush3.bf16.msra.mxu0 %v1430_v31 }
 0x2c3   :  { %v767_v41 = vpop.f32.mrf.mxu0 }
 0x2c4   :  { %v818_v42 = vadd.f32 %v817_v37, %v767_v41 }
 0x2c5   :  { %v1328_v43 = vpop.f32.mrf.mxu0 }
 0x2c6   :  { %v828_v48 = vadd.f32 %v1201_v21, %v818_v42 }
 0x2c7   :  { %v770_v50 = vpop.f32.mrf.mxu0 }
 0x2c8   :  { %v821_v51 = vadd.f32 %v820_v40, %v770_v50  ;;  %v830_v47 = vmax.f32 %v828_v48, 0.0  ;;  %v147_v50 = vld [vmem:[#allocation8 + $0x70] sm:$0xff] }
 0x2c9   :  { %v1329_v52 = vpop.f32.mrf.mxu0  ;;  %1360 = vmatprep.subr.mxu1 %v147_v50 }
 0x2ca   :  { %835 = vadd.xlane.f32.xlu0 %v830_v47  ;;  %v829_v53 = vadd.f32 %v1201_v21, %v821_v51  ;;  %v146_v51 = vld [vmem:[#allocation8 + $0x68] sm:$0xff]  ;;  %1361 = vmatpush3.msra.mxu1 %v147_v50  ;;  %v144_v52 = vld [vmem:[#allocation8 + $0x58] sm:$0xff] }
 0x2cb   :  { %1362 = vmatprep.subr.mxu1 %v146_v51 }
 0x2cc   :  { %v831_v54 = vmax.f32 %v829_v53, 0.0  ;;  %1363 = vmatpush3.msra.mxu1 %v146_v51  ;;  %v143_v53 = vld [vmem:[#allocation8 + $0x50] sm:$0xff] }
 0x2ce   :  { %837 = vadd.xlane.f32.xlu1 %v831_v54 }
 0x353   :  { %v836_v6 = vpop.xlane.xlu0 %835 }
 0x354   :  { %v840_v22 = vmul.f32 0.015625, %v836_v6  ;;  %v139_v6 = vld [vmem:[#allocation8 + $0x30] sm:$0xff] }
 0x356   :  { %v842_v59 = vsub.f32 %v830_v47, %v840_v22  ;;  %v145_v47 = vld [vmem:[#allocation8 + $0x60] sm:$0xff]  ;;  %v138_v22 = vld [vmem:[#allocation8 + $0x28] sm:$0xff] }
 0x357   :  { %v838_v38 = vpop.xlane.xlu1 %837  ;;  %1364 = vmatprep.subr.mxu1 %v145_v47 }
 0x358   :  { %v841_v61 = vmul.f32 0.015625, %v838_v38  ;;  %v844_v62 = vsel %vm834_vm9, %v842_v59, 0.0  ;;  %1365 = vmatpush3.msra.mxu1 %v145_v47  ;;  %v137_v59 = vld [vmem:[#allocation8 + $0x20] sm:$0xff]  ;;  %v136_v38 = vld [vmem:[#allocation8 + $0x18] sm:$0xff] }
 0x359   :  { %v846_v17 = vmul.f32 %v844_v62, %v844_v62  ;;  %1366 = vmatprep.subr.mxu1 %v144_v52 }
 0x35a   :  { %v843_v63 = vsub.f32 %v831_v54, %v841_v61  ;;  %1367 = vmatpush3.msra.mxu1 %v144_v52  ;;  %v142_v54 = vld [vmem:[#allocation8 + $0x48] sm:$0xff]  ;;  %v135_v61 = vld [vmem:[#allocation8 + $0x10] sm:$0xff] }
 0x35b   :  { %848 = vadd.xlane.f32.xlu0 %v846_v17  ;;  %1368 = vmatprep.subr.mxu1 %v143_v53 }
 0x35c   :  { %v845_v0 = vsel %vm834_vm9, %v843_v63, 0.0  ;;  %1369 = vmatpush3.msra.mxu1 %v143_v53 }
 0x35d   :  { %v847_v1 = vmul.f32 %v845_v0, %v845_v0  ;;  %1370 = vmatprep.subr.mxu1 %v142_v54 }
 0x35e   :  { %1371 = vmatpush3.msra.mxu1 %v142_v54 }
 0x35f   :  { %850 = vadd.xlane.f32.xlu0 %v847_v1  ;;  %1372 = vmatprep.subr.mxu1 %v141_v56 }
 0x360   :  { %1373 = vmatpush3.msra.mxu1 %v141_v56 }
 0x361   :  { %1374 = vmatprep.subr.mxu1 %v140_v57 }
 0x362   :  { %1375 = vmatpush3.msra.mxu1 %v140_v57 }
 0x363   :  { %1376 = vmatprep.subr.mxu1 %v139_v6 }
 0x364   :  { %1377 = vmatpush3.msra.mxu1 %v139_v6 }
 0x365   :  { %1378 = vmatprep.subr.mxu1 %v138_v22 }
 0x366   :  { %1379 = vmatpush3.msra.mxu1 %v138_v22 }
 0x367   :  { %1380 = vmatprep.subr.mxu1 %v137_v59 }
 0x368   :  { %1381 = vmatpush3.msra.mxu1 %v137_v59 }
 0x369   :  { %1382 = vmatprep.subr.mxu1 %v136_v38 }
 0x36a   :  { %1383 = vmatpush3.msra.mxu1 %v136_v38 }
 0x36b   :  { %1384 = vmatprep.subr.mxu1 %v135_v61 }
 0x36c   :  { %1385 = vmatpush3.msra.mxu1 %v135_v61 }
 0x3e4   :  { %v849_v8 = vpop.xlane.xlu0 %848 }
 0x3e5   :  { %v852_v9 = vmul.f32 0.015625, %v849_v8 }
 0x3e7   :  { %v854_v10 = vadd.f32 1e-05, %v852_v9 }
 0x3e8   :  { %v851_v11 = vpop.xlane.xlu0 %850 }
 0x3e9   :  { %1431 = vrsqrt.f32 %v854_v10  ;;  %v853_v12 = vmul.f32 0.015625, %v851_v11 }
 0x3eb   :  { %v855_v13 = vadd.f32 1e-05, %v853_v12 }
 0x3ed   :  { %1433 = vrsqrt.f32 %v855_v13  ;;  %v1215_v13 = vld [vmem:[#allocation8 + $0x88] ss:$0 sm:$0xff] }
 0x3f6   :  { %v1432_v14 = vpop.eup %1431 }
 0x3f7   :  { %v858_v44 = vmul.f32 %v1432_v14, %v844_v62  ;;  %v134_v62 = vld [vmem:[#allocation8 + $0x8] sm:$0xff] }
 0x3f8   :  { %1386 = vmatprep.subr.mxu1 %v134_v62 }
 0x3f9   :  { %v864_v20 = vmul.f32 %v1202_v18, %v858_v44  ;;  %1387 = vmatpush3.msra.mxu1 %v134_v62 }
 0x3fa   :  { %v1434_v46 = vpop.eup %1433 }
 0x3fb   :  { %v859_v19 = vmul.f32 %v1434_v46, %v845_v0  ;;  %v870_v60 = vadd.f32 %v1203_v23, %v864_v20 }
 0x3fd   :  { %v865_v24 = vmul.f32 %v1202_v18, %v859_v19 }
 0x3ff   :  { %v871_v25 = vadd.f32 %v1203_v23, %v865_v24 }
 0x401   :  { %v872_v27 = vpack.c.bf16 %v871_v25, %v870_v60 }
 0x403   :  { %1353 = vmatmul.mubr.bf16.vlgmr.msra.gmra.mxu0 %v872_v27 }
 0x4c3   :  { %v959_v15 = vpop.f32.mrf.mxu0 }
 0x4c4   :  { %v960_v28 = vadd.f32 %v1204_v26, %v959_v15 }
 0x4c5   :  { %v1354_v29 = vpop.f32.mrf.mxu0 }
 0x4c6   :  { %v966_v30 = vmax.f32 %v960_v28, 0.0 }
 0x4c7   :  { %v962_v32 = vpop.f32.mrf.mxu0 }
 0x4c8   :  { %v963_v33 = vadd.f32 %v1204_v26, %v962_v32  ;;  %968 = vadd.xlane.f32.xlu1 %v966_v30 }
 0x4c9   :  { %v1355_v45 = vpop.f32.mrf.mxu0 }
 0x4ca   :  { %v967_v2 = vmax.f32 %v963_v33, 0.0 }
 0x4cc   :  { %970 = vadd.xlane.f32.xlu0 %v967_v2 }
 0x551   :  { %v969_v36 = vpop.xlane.xlu1 %968 }
 0x552   :  { %v972_v37 = vmul.f32 0.015625, %v969_v36 }
 0x554   :  { %v974_v39 = vsub.f32 %v966_v30, %v972_v37 }
 0x555   :  { %v971_v40 = vpop.xlane.xlu0 %970 }
 0x556   :  { %v973_v16 = vmul.f32 0.015625, %v971_v40  ;;  %v976_v41 = vsel %vm834_vm9, %v974_v39, 0.0 }
 0x557   :  { %v978_v21 = vmul.f32 %v976_v41, %v976_v41 }
 0x558   :  { %v975_v42 = vsub.f32 %v967_v2, %v973_v16 }
 0x559   :  { %980 = vadd.xlane.f32.xlu1 %v978_v21 }
 0x55a   :  { %v977_v43 = vsel %vm834_vm9, %v975_v42, 0.0 }
 0x55b   :  { %v979_v48 = vmul.f32 %v977_v43, %v977_v43 }
 0x55d   :  { %982 = vadd.xlane.f32.xlu0 %v979_v48 }
 0x5e2   :  { %v981_v17 = vpop.xlane.xlu1 %980 }
 0x5e3   :  { %v984_v63 = vmul.f32 0.015625, %v981_v17 }
 0x5e5   :  { %v986_v0 = vadd.f32 1e-05, %v984_v63 }
 0x5e6   :  { %v983_v1 = vpop.xlane.xlu0 %982 }
 0x5e7   :  { %1435 = vrsqrt.f32 %v986_v0  ;;  %v985_v3 = vmul.f32 0.015625, %v983_v1 }
 0x5e9   :  { %v987_v49 = vadd.f32 1e-05, %v985_v3 }
 0x5eb   :  { %1437 = vrsqrt.f32 %v987_v49 }
 0x5f4   :  { %v1436_v4 = vpop.eup %1435 }
 0x5f5   :  { %v990_v55 = vmul.f32 %v1436_v4, %v976_v41 }
 0x5f7   :  { %v996_v31 = vmul.f32 %v1213_v5, %v990_v55 }
 0x5f8   :  { %v1438_v8 = vpop.eup %1437 }
 0x5f9   :  { %v991_v9 = vmul.f32 %v1438_v8, %v977_v43  ;;  %v1002_v10 = vadd.f32 %v1214_v7, %v996_v31 }
 0x5fb   :  { %v997_v11 = vmul.f32 %v1213_v5, %v991_v9  ;;  %1388 = vmatprep.mubr.f32.mxu1 %v1002_v10 }
 0x5fd   :  { %v1003_v12 = vadd.f32 %v1214_v7, %v997_v11 }
 0x5ff   :  { %1389 = vmatmul.mubr.f32.vlgmr.msra.gmra.mxu1 %v1003_v12 }
 0x6bf   :  { %v1390_v14 = vpop.f32.mrf.mxu1 }
 0x6c0   :  { %v1080_v44 = vadd.f32 %v1390_v14, %v1215_v13 }
 0x6c1   :  { %v1074_v18 = vpop.f32.mrf.mxu1 }
 0x6c2   :  { %v1075_v46 = vadd.f32 %v1215_v13, %v1074_v18  ;;  %v1085_v19 = vsel %vm1083_vm10, %v1080_v44, -1e+30 }
 0x6c3   :  { %1088 = vmax.xlane.f32.xlu0 %v1085_v19 }
 0x6c4   :  { %v1084_v20 = vsel %vm1083_vm10, %v1075_v46, -1e+30 }
 0x6c5   :  { %1086 = vmax.xlane.f32.xlu1 %v1084_v20 }
 0x74c   :  { %v1089_v23 = vpop.xlane.xlu0 %1088 }
 0x74d   :  { %v1091_v24 = vsub.f32 %v1085_v19, %v1089_v23  ;;  %vm1105_vm11 = vcmp.eq.f32.partialorder %v1085_v19, %v1089_v23 }
 0x74e   :  { %v1107_v60 = vsel %vm1105_vm11, %v1716_v58, 128  ;;  %v1087_v25 = vpop.xlane.xlu1 %1086 }
 0x74f   :  { %v1094_v27 = vmul.f32 1.442695, %v1091_v24  ;;  %v1090_v26 = vsub.f32 %v1084_v20, %v1087_v25  ;;  %vm1104_vm12 = vcmp.eq.f32.partialorder %v1084_v20, %v1087_v25  ;;  %v1123_v15 = vshra.s32 %v1107_v60, 16 }
 0x750   :  { %v1106_v28 = vsel %vm1104_vm12, %v1716_v58, 128  ;;  %v1122_v34 = vand.u32 65535, %v1107_v60 }
 0x751   :  { %1439 = vpow2.f32 %v1094_v27  ;;  %v1092_v29 = vmul.f32 1.442695, %v1090_v26  ;;  %v1125_v30 = vcvt.s32.f32 %v1123_v15  ;;  %v1109_v32 = vshra.s32 %v1106_v28, 16 }
 0x752   :  { %v1108_v35 = vand.u32 65535, %v1106_v28  ;;  %v1124_v37 = vcvt.s32.f32 %v1122_v34 }
 0x753   :  { %1441 = vpow2.f32 %v1092_v29  ;;  %1126 = vmin.xlane.f32.xlu0 %v1125_v30  ;;  %v1111_v33 = vcvt.s32.f32 %v1109_v32 }
 0x754   :  { %v1110_v16 = vcvt.s32.f32 %v1108_v35 }
 0x755   :  { %1112 = vmin.xlane.f32.xlu1 %v1111_v33 }
 0x75e   :  { %v1440_v45 = vpop.eup %1439 }
 0x75f   :  { %1098 = vadd.xlane.f32.xlu0 %v1440_v45 }
 0x760   :  { %v1442_v2 = vpop.eup %1441 }
 0x761   :  { %1096 = vadd.xlane.f32.xlu1 %v1442_v2 }
 0x7dc   :  { %v1127_v36 = vpop.xlane.xlu0 %1126 }
 0x7dd   :  { %vm1128_vm13 = vcmp.eq.f32.partialorder %v1125_v30, %v1127_v36  ;;  %v1133_v48 = vcvt.f32.s32 %v1127_v36 }
 0x7de   :  { %v1113_v39 = vpop.xlane.xlu1 %1112  ;;  %v1129_v40 = vsel %vm1128_vm13, %v1124_v37, inf }
 0x7df   :  { %1130 = vmin.xlane.f32.xlu0 %v1129_v40  ;;  %vm1114_vm14 = vcmp.eq.f32.partialorder %v1111_v33, %v1113_v39  ;;  %v1119_v51 = vcvt.f32.s32 %v1113_v39  ;;  %v1134_v53 = vshll.u32 %v1133_v48, 16 }
 0x7e0   :  { %v1115_v41 = vsel %vm1114_vm14, %v1110_v16, inf }
 0x7e1   :  { %1116 = vmin.xlane.f32.xlu1 %v1115_v41  ;;  %v1120_v6 = vshll.u32 %v1119_v51, 16 }
 0x7e8   :  { %v1099_v21 = vpop.xlane.xlu0 %1098 }
 0x7e9   :  { %1443 = vlog2.f32 %v1099_v21 }
 0x7ea   :  { %v1097_v42 = vpop.xlane.xlu1 %1096 }
 0x7eb   :  { %1445 = vlog2.f32 %v1097_v42 }
 0x7f6   :  { %v1444_v43 = vpop.eup %1443 }
 0x7f7   :  { %v1103_v47 = vmul.f32 0.6931472, %v1444_v43 }
 0x7f8   :  { %v1446_v50 = vpop.eup %1445 }
 0x7f9   :  { %v1101_v56 = vmul.f32 0.6931472, %v1446_v50  ;;  %v1139_v38 = vsub.f32 %v1091_v24, %v1103_v47 }
 0x7fb   :  { %v1138_v17 = vsub.f32 %v1090_v26, %v1101_v56 }
 0x868   :  { %v1131_v52 = vpop.xlane.xlu0 %1130 }
 0x869   :  { %v1132_v54 = vcvt.f32.s32 %v1131_v52 }
 0x86a   :  { %v1117_v57 = vpop.xlane.xlu1 %1116 }
 0x86b   :  { %v1135_v22 = vadd.s32 %v1134_v53, %v1132_v54  ;;  %v1118_v59 = vcvt.f32.s32 %v1117_v57 }
 0x86d   :  { %v1121_v61 = vadd.s32 %v1120_v6, %v1118_v59  ;;  %vm1137_vm15 = vcmp.eq.s32.totalorder %v1716_v58, %v1135_v22  ;;  %v1148_v0 = vcvt.s32.f32 %v1135_v22 }
 0x86e   :  { %v1141_v62 = vsel %vm1137_vm15, %v1139_v38, 0.0 }
 0x86f   :  { %1144 = vadd.xlane.f32.xlu0 %v1141_v62  ;;  %vm1136_vm0 = vcmp.eq.s32.totalorder %v1716_v58, %v1121_v61  ;;  %v1147_v3 = vcvt.s32.f32 %v1121_v61 }
 0x870   :  { %v1140_v63 = vsel %vm1136_vm0, %v1138_v17, 0.0 }
 0x871   :  { %1142 = vadd.xlane.f32.xlu1 %v1140_v63 }
 0x8f8   :  { %v1145_v1 = vpop.xlane.xlu0 %1144 }
 0x8f9   :  { %v1150_v49 = vsel %vm1146_vm1, %v1148_v0, %v1145_v1 }
 0x8fa   :  { %1152 = vst [vmem:[#allocation10 + $0x8] sm:$0xff] %v1150_v49  ;;  %v1143_v4 = vpop.xlane.xlu1 %1142 }
 0x8fb   :  { %v1149_v5 = vsel %vm1146_vm1, %v1147_v3, %v1143_v4 }
 0x8fc   :  { %1151 = vst [vmem:[#allocation10] sm:$0xff] %v1149_v5 }
 0x8fd   :  { %1538 = shalt.err (!%p1535_p10)
}
 0x8fe   :  { %1164 = dma.vmem_to_hbm [thread:$0]  %s1159_s3, 256, %s1749_s4, [#allocation4], %s1557_s20, %s1557_s20, %s1558_s21  }
 0x8ff   :  { %1553 = dma.done.wait [#allocation4], 256  }
 0x900   :  { %1554 = vsyncadd [#allocation4], 4294967040 }
 0x901   :  { %1168 = vsyncpa [#allocation3], 1 }
 0x902   :  { %1169 = vsyncpa [#allocation6], 1 }
 0x903   :  { %1170 = vsyncpa [#allocation9], 1 }
 0x904   :  { %1171 = vsyncpa [#allocation4], 1 }

</bundles_post_ra>
